<compile_context>
chip_gen: v7x
topology: tpu7x:2x2x1
jax: 0.10.0
libtpu: 0.0.40
codegen_flags: <defaults>
</compile_context>

<pallas_src>
import functools

import jax
import jax.numpy as jnp
from jax.experimental import pallas as pl
from jax.experimental.pallas import tpu as pltpu

LANE = 128
MAX_TILE_LANES = 32768          # cap pixels/step (keeps the (1,T) accumulator small)
X_BLOCK_BYTES = 512 * 1024      # ~512 KiB of logits per grid step (mem-bound regime)


def _round_up(n, m):
    return ((n + m - 1) // m) * m


def _choose_tile(hw, nc):
    t = (X_BLOCK_BYTES // (4 * nc) // LANE) * LANE
    t = max(LANE, min(t, MAX_TILE_LANES))
    return min(t, _round_up(hw, LANE))


def _make_kernel(hw, gamma, inv_denom):
    """Builds the focal-loss kernel with static HW / gamma / normalization."""

    def kernel(alpha_ref, x_ref, t_ref, loss_ref, acc_ref):
        b, j = pl.program_id(0), pl.program_id(1)
        nb, nj = pl.num_programs(0), pl.num_programs(1)

        @pl.when(jnp.logical_and(b == 0, j == 0))
        def _():
            acc_ref[...] = jnp.zeros_like(acc_ref)

        x = x_ref[...].astype(jnp.float32)        # (C, T) logits
        t = t_ref[...]                            # (1, T) int32 class ids
        nc, tile = x.shape

        # In-kernel mask for the ragged last tile along HW (no host padding).
        pix = j * tile + jax.lax.broadcasted_iota(jnp.int32, (1, tile), 1)
        valid = pix < hw
        x = jnp.where(valid, x, 0.0)
        t = jnp.where(valid, t, 0)

        # Per-pixel softmax cross-entropy over the class (sublane) axis.
        m = jnp.max(x, axis=0, keepdims=True)                     # (1, T)
        e = jnp.exp(x - m)                                        # (C, T)  EUP
        lse = jnp.log(jnp.sum(e, axis=0, keepdims=True)) + m      # (1, T)

        onehot = (jax.lax.broadcasted_iota(jnp.int32, (nc, tile), 0)
                  == t).astype(jnp.float32)                       # (C, T)
        x_true = jnp.sum(x * onehot, axis=0, keepdims=True)       # true-class logit
        alpha_t = jnp.sum(alpha_ref[...] * onehot, axis=0, keepdims=True)

        ce = lse - x_true                                         # (1, T)
        pt = jnp.exp(-ce)
        one_m_pt = 1.0 - pt
        if float(gamma).is_integer() and gamma >= 0:
            g = int(gamma)
            mod = jnp.ones_like(ce) if g == 0 else one_m_pt
            for _ in range(g - 1):                                # gamma=2 -> one vmul
                mod = mod * one_m_pt
        else:
            mod = one_m_pt ** jnp.float32(gamma)

        loss_vec = jnp.where(valid, alpha_t * mod * ce, 0.0)      # (1, T)

        # Vector accumulation on the VPU; cross-lane reduce only once, at end.
        acc_ref[...] += loss_vec

        @pl.when(jnp.logical_and(b == nb - 1, j == nj - 1))
        def _():
            loss_ref[0] = jnp.sum(acc_ref[...]) * inv_denom

    return kernel


@functools.partial(jax.jit, static_argnames=("gamma", "reduction"))
def focal_loss(logits, targets, alpha, gamma=2.0, reduction="mean"):
    """Pallas implementation of FocalLoss.forward (reduction='mean' or 'sum')."""
    if reduction not in ("mean", "sum"):
        # TODO(synk): reduction='none' (per-pixel loss map output) not implemented.
        raise NotImplementedError("only 'mean'/'sum' reductions are supported")

    bsz, nc, h, w = logits.shape
    hw = h * w
    x = logits.reshape(bsz, nc, hw).astype(jnp.float32)   # free, contiguous reshape
    t = targets.reshape(bsz, 1, hw).astype(jnp.int32)
    a = jnp.asarray(alpha, jnp.float32).reshape(nc, 1)

    tile = _choose_tile(hw, nc)
    n_j = pl.cdiv(hw, tile)
    inv_denom = 1.0 / float(bsz * hw) if reduction == "mean" else 1.0

    loss = pl.pallas_call(
        _make_kernel(hw, gamma, inv_denom),
        out_shape=jax.ShapeDtypeStruct((1,), jnp.float32),
        grid_spec=pltpu.PrefetchScalarGridSpec(
            num_scalar_prefetch=0,
            grid=(bsz, n_j),
            in_specs=[
                pl.BlockSpec((nc, 1), lambda b, j: (0, 0)),               # alpha
                pl.BlockSpec((None, nc, tile), lambda b, j: (b, 0, j)),   # logits
                pl.BlockSpec((None, 1, tile), lambda b, j: (b, 0, j)),    # targets
            ],
            out_specs=pl.BlockSpec(memory_space=pltpu.SMEM),
            scratch_shapes=[pltpu.VMEM((1, tile), jnp.float32)],
        ),
        compiler_params=pltpu.CompilerParams(
            dimension_semantics=("arbitrary", "arbitrary")),
    )(a, x, t)
    return loss[0]


def focal_loss_ref(logits, targets, alpha, gamma=2.0, reduction="mean"):
    """Pure-JAX reference matching the PyTorch FocalLoss module."""
    logp = jax.nn.log_softmax(logits.astype(jnp.float32), axis=1)
    t = targets.astype(jnp.int32)
    ce = -jnp.take_along_axis(logp, t[:, None], axis=1)[:, 0]   # (B,H,W)
    pt = jnp.exp(-ce)
    alpha_t = jnp.asarray(alpha, jnp.float32)[t]
    loss = alpha_t * (1.0 - pt) ** gamma * ce
    if reduction == "mean":
        return loss.mean()
    if reduction == "sum":
        return loss.sum()
    return loss


if __name__ == "__main__":
    key = jax.random.PRNGKey(0)
    k1, k2 = jax.random.split(key)
    B, C, H, W = 2, 4, 16, 16
    logits = jax.random.normal(k1, (B, C, H, W), dtype=jnp.float32)
    targets = jax.random.randint(k2, (B, H, W), 0, C, dtype=jnp.int32)
    alpha = jnp.array([0.25, 0.5, 0.75, 1.0], dtype=jnp.float32)

    out = focal_loss(logits, targets, alpha, gamma=2.0)
    out = jax.block_until_ready(out)

    ref = focal_loss_ref(logits, targets, alpha, gamma=2.0)
    assert jnp.allclose(out, ref, rtol=1e-5, atol=1e-5), (out, ref)
    print("KERNEL_OK")
</pallas_src>

<mosaic_0001>
module attributes {stable_mosaic.version = 11 : i64} {
  func.func @kernel(%arg0: i32, %arg1: i32, %arg2: memref<4x1xf32, #tpu.memory_space<vmem>>, %arg3: memref<1x4x256xf32, #tpu.memory_space<vmem>>, %arg4: memref<1x1x256xi32, #tpu.memory_space<vmem>>, %arg5: memref<1xf32, #tpu.memory_space<smem>>, %arg6: memref<1x256xf32, #tpu.memory_space<vmem>>) attributes {dimension_semantics = [#tpu.dimension_semantics<arbitrary>, #tpu.dimension_semantics<arbitrary>], iteration_bounds = array<i64: 2, 1>, scalar_prefetch = 0 : i64, scratch_operands = 1 : i64, tpu.core_type = #tpu.core_type<tc>, window_params = [{pipeline_mode = #tpu.pipeline_mode<synchronous>, transform_indices = @transform_0, window_bounds = array<i64: 4, 1>}, {transform_indices = @transform_1, window_bounds = array<i64: 1, 4, 256>}, {transform_indices = @transform_2, window_bounds = array<i64: 1, 1, 256>}, {transform_indices = @transform_3, window_bounds = array<i64: 1>}]} {
    %c0_i32 = arith.constant 0 : i32
    %0 = arith.cmpi eq, %arg0, %c0_i32 : i32
    %c0_i32_0 = arith.constant 0 : i32
    %1 = arith.cmpi eq, %arg1, %c0_i32_0 : i32
    %2 = arith.andi %0, %1 : i1
    %3 = arith.extui %2 : i1 to i32
    %c0_i32_1 = arith.constant 0 : i32
    %4 = arith.cmpi ne, %3, %c0_i32_1 : i32
    scf.if %4 {
      %cst_24 = arith.constant 0.000000e+00 : f32
      %62 = vector.broadcast %cst_24 : f32 to vector<1x256xf32>
      %c0_25 = arith.constant 0 : index
      %c0_26 = arith.constant 0 : index
      %63 = vector.load %arg6[%c0_25, %c0_26] : memref<1x256xf32, #tpu.memory_space<vmem>>, vector<1x256xf32>
      tpu.vector_store %arg6[%c0_25, %c0_26], %62 {strides = array<i32>} : memref<1x256xf32, #tpu.memory_space<vmem>>, vector<1x256xf32>,
    } else {
    }
    %c0 = arith.constant 0 : index
    %c0_2 = arith.constant 0 : index
    %c0_3 = arith.constant 0 : index
    %5 = vector.load %arg3[%c0, %c0_2, %c0_3] : memref<1x4x256xf32, #tpu.memory_space<vmem>>, vector<1x4x256xf32>
    %6 = vector.shape_cast %5 : vector<1x4x256xf32> to vector<4x256xf32>
    %c0_4 = arith.constant 0 : index
    %c0_5 = arith.constant 0 : index
    %c0_6 = arith.constant 0 : index
    %7 = vector.load %arg4[%c0_4, %c0_5, %c0_6] : memref<1x1x256xi32, #tpu.memory_space<vmem>>, vector<1x1x256xi32>
    %8 = vector.shape_cast %7 : vector<1x1x256xi32> to vector<1x256xi32>
    %c256_i32 = arith.constant 256 : i32
    %9 = arith.muli %arg1, %c256_i32 : i32
    %10 = tpu.iota {dimensions = array<i32: 1>} : vector<1x256xi32>
    %11 = vector.broadcast %9 : i32 to vector<1x256xi32>
    %12 = arith.addi %11, %10 : vector<1x256xi32>
    %c256_i32_7 = arith.constant 256 : i32
    %13 = vector.broadcast %c256_i32_7 : i32 to vector<1x256xi32>
    %14 = arith.cmpi slt, %12, %13 : vector<1x256xi32>
    %cst = arith.constant 0.000000e+00 : f32
    %15 = vector.shape_cast %14 : vector<1x256xi1> to vector<1x256xi1>
    %16 = vector.broadcast %15 : vector<1x256xi1> to vector<4x256xi1>
    %17 = vector.broadcast %cst : f32 to vector<4x256xf32>
    %18 = arith.select %16, %6, %17 : vector<4x256xi1>, vector<4x256xf32>
    %c0_i32_8 = arith.constant 0 : i32
    %19 = vector.broadcast %c0_i32_8 : i32 to vector<1x256xi32>
    %20 = arith.select %14, %8, %19 : vector<1x256xi1>, vector<1x256xi32>
    %cst_9 = arith.constant dense<0xFF800000> : vector<256xf32>
    %21 = vector.multi_reduction <maximumf>, %18, %cst_9 [0] : vector<4x256xf32> to vector<256xf32>
    %22 = vector.shape_cast %21 : vector<256xf32> to vector<1x256xf32>
    %23 = vector.broadcast %22 : vector<1x256xf32> to vector<4x256xf32>
    %24 = arith.subf %18, %23 : vector<4x256xf32>
    %25 = math.exp %24 : vector<4x256xf32>
    %cst_10 = arith.constant dense<0.000000e+00> : vector<256xf32>
    %26 = vector.multi_reduction <add>, %25, %cst_10 [0] : vector<4x256xf32> to vector<256xf32>
    %27 = vector.shape_cast %26 : vector<256xf32> to vector<1x256xf32>
    %28 = math.log %27 : vector<1x256xf32>
    %29 = arith.addf %28, %22 : vector<1x256xf32>
    %30 = tpu.iota {dimensions = array<i32: 0>} : vector<4x256xi32>
    %31 = vector.broadcast %20 : vector<1x256xi32> to vector<4x256xi32>
    %32 = arith.cmpi eq, %30, %31 : vector<4x256xi32>
    %33 = arith.extui %32 : vector<4x256xi1> to vector<4x256xi32>
    %34 = arith.sitofp %33 : vector<4x256xi32> to vector<4x256xf32>
    %35 = arith.mulf %18, %34 : vector<4x256xf32>
    %cst_11 = arith.constant dense<0.000000e+00> : vector<256xf32>
    %36 = vector.multi_reduction <add>, %35, %cst_11 [0] : vector<4x256xf32> to vector<256xf32>
    %37 = vector.shape_cast %36 : vector<256xf32> to vector<1x256xf32>
    %c0_12 = arith.constant 0 : index
    %c0_13 = arith.constant 0 : index
    %38 = vector.load %arg2[%c0_12, %c0_13] : memref<4x1xf32, #tpu.memory_space<vmem>>, vector<4x1xf32>
    %39 = vector.broadcast %38 : vector<4x1xf32> to vector<4x256xf32>
    %40 = arith.mulf %39, %34 : vector<4x256xf32>
    %cst_14 = arith.constant dense<0.000000e+00> : vector<256xf32>
    %41 = vector.multi_reduction <add>, %40, %cst_14 [0] : vector<4x256xf32> to vector<256xf32>
    %42 = vector.shape_cast %41 : vector<256xf32> to vector<1x256xf32>
    %43 = arith.subf %29, %37 : vector<1x256xf32>
    %cst_15 = arith.constant 0.000000e+00 : f32
    %44 = vector.broadcast %cst_15 : f32 to vector<1x256xf32>
    %45 = arith.subf %44, %43 : vector<1x256xf32>
    %46 = math.exp %45 : vector<1x256xf32>
    %cst_16 = arith.constant 1.000000e+00 : f32
    %47 = vector.broadcast %cst_16 : f32 to vector<1x256xf32>
    %48 = arith.subf %47, %46 : vector<1x256xf32>
    %49 = arith.mulf %48, %48 : vector<1x256xf32>
    %50 = arith.mulf %42, %49 : vector<1x256xf32>
    %51 = arith.mulf %50, %43 : vector<1x256xf32>
    %cst_17 = arith.constant 0.000000e+00 : f32
    %52 = vector.broadcast %cst_17 : f32 to vector<1x256xf32>
    %53 = arith.select %14, %51, %52 : vector<1x256xi1>, vector<1x256xf32>
    %c0_18 = arith.constant 0 : index
    %c0_19 = arith.constant 0 : index
    %54 = vector.load %arg6[%c0_18, %c0_19] : memref<1x256xf32, #tpu.memory_space<vmem>>, vector<1x256xf32>
    %55 = arith.addf %54, %53 : vector<1x256xf32>
    %c0_20 = arith.constant 0 : index
    %c0_21 = arith.constant 0 : index
    %56 = vector.load %arg6[%c0_20, %c0_21] : memref<1x256xf32, #tpu.memory_space<vmem>>, vector<1x256xf32>
    tpu.vector_store %arg6[%c0_20, %c0_21], %55 {strides = array<i32>} : memref<1x256xf32, #tpu.memory_space<vmem>>, vector<1x256xf32>,
    %c1_i32 = arith.constant 1 : i32
    %57 = arith.cmpi eq, %arg0, %c1_i32 : i32
    %c0_i32_22 = arith.constant 0 : i32
    %58 = arith.cmpi eq, %arg1, %c0_i32_22 : i32
    %59 = arith.andi %57, %58 : i1
    %60 = arith.extui %59 : i1 to i32
    %c0_i32_23 = arith.constant 0 : i32
    %61 = arith.cmpi ne, %60, %c0_i32_23 : i32
    scf.if %61 {
      %c0_24 = arith.constant 0 : index
      %c0_25 = arith.constant 0 : index
      %62 = vector.load %arg6[%c0_24, %c0_25] : memref<1x256xf32, #tpu.memory_space<vmem>>, vector<1x256xf32>
      %63 = vector.shape_cast %62 : vector<1x256xf32> to vector<1x1x256xf32>
      %cst_26 = arith.constant dense<0.000000e+00> : vector<1xf32>
      %64 = vector.multi_reduction <add>, %63, %cst_26 [1, 2] : vector<1x1x256xf32> to vector<1xf32>
      %65 = vector.shape_cast %64 : vector<1xf32> to vector<1x1x1xf32>
      %66 = vector.extract %65[0, 0, 0] : f32 from vector<1x1x1xf32>
      %cst_27 = arith.constant 0.001953125 : f32
      %67 = arith.mulf %66, %cst_27 : f32
      %c0_28 = arith.constant 0 : index
      %68 = memref.load %arg5[%c0_28] : memref<1xf32, #tpu.memory_space<smem>>
      memref.store %67, %arg5[%c0_28] : memref<1xf32, #tpu.memory_space<smem>>
    } else {
    }
    return
  }
  func.func @transform_0(%arg0: i32, %arg1: i32) -> (i32, i32) {
    %c0_i32 = arith.constant 0 : i32
    %c0_i32_0 = arith.constant 0 : i32
    %c0_i32_1 = arith.constant 0 : i32
    return %c0_i32, %c0_i32_0 : i32, i32
  }
  func.func @transform_1(%arg0: i32, %arg1: i32) -> (i32, i32, i32) {
    %c0_i32 = arith.constant 0 : i32
    %c0_i32_0 = arith.constant 0 : i32
    return %arg0, %c0_i32, %arg1 : i32, i32, i32
  }
  func.func @transform_2(%arg0: i32, %arg1: i32) -> (i32, i32, i32) {
    %c0_i32 = arith.constant 0 : i32
    %c0_i32_0 = arith.constant 0 : i32
    return %arg0, %c0_i32, %arg1 : i32, i32, i32
  }
  func.func @transform_3(%arg0: i32, %arg1: i32) -> i32 {
    %c0_i32 = arith.constant 0 : i32
    %c0_i32_0 = arith.constant 0 : i32
    return %c0_i32 : i32
  }
}

</mosaic_0001>

<bundles_post_ra>
// kernel: focal_loss.1
= control target key start
LH: loop header
LB: loop body
LE: loop exit
PB: predicated region body
PF: predicated region fallthrough
CT: control target
= control target key end

     0   :  { %8 = vsyncpa [#allocation4], 0  ;;  %s639_s12 = smov 0   ;;  %s641_s13 = smov 0   ;;  %s728_s0 = inlined_call_operand.vmem [shape: f32[4,1], index: 0, kind: input, shape index: {}]   ;;  %s729_s1 = inlined_call_operand.vmem [shape: f32[2,4,256], index: 1, kind: input, shape index: {}]   ;;  %s730_s2 = inlined_call_operand.vmem [shape: s32[2,1,256], index: 2, kind: input, shape index: {}]   ;;  %s731_s3 = inlined_call_operand.hbm [shape: f32[1], index: 3, kind: output, shape index: {}]  }
   0x1   :  { %s643_s14 = smov 0  }
   0x2 LB: > { %s505_s15 = sadd.s32 4294967295, %s612_s14   ;;  %s26_s16 = sadd.s32 1, %s608_s13  ;;  %s612_s14 = sphi %s643_s14, %s14_s14   ;;  %s608_s13 = sphi %s641_s13, %s733_s13   ;;  %s604_s12 = sphi %s639_s12, %s732_s12  }
   0x3   : > { %p28_p0 = scmp.ge.s32.totalorder %s26_s16, 2  ;;  %p508_p1 = scmp.ge.s32.totalorder %s612_s14, 1 }
   0x4   : > { %p168_p2 = scmp.lt.s32.totalorder %s612_s14, 3 }
   0x5   : > { %s735_s16 = smov (%p28_p0, %s26_s16), 0 }
   0x6   : > { %p169_p3 = pnand %p508_p1, %p168_p2 }
   0x7   : > { %p200_p4 = scmp.lt.s32.totalorder (!%p169_p3), %s604_s12, 1  ;;  %p218_p5 = scmp.eq.s32.totalorder (!%p169_p3), %s604_s12, 0 }
   0x8   : > { %172 = sbr.rel (%p169_p3) target bundleno = 415 (0x19f), region = 32 }
   0xf   : > { %s201_s17 = scalar_select %p200_p4, %s604_s12, 1 }
  0x10   : > { %223 = sbr.rel (!%p218_p5) target bundleno = 23 (0x17), region = 36  ;;  %v224_v0 = vlaneseq (%p218_p5)  ;;  %v614_v1 = vmov (%p218_p5), 0.0  }
  0x11   : > { %s520_s18 = sshll.u32 %s201_s17, 3  ;;  %s511_s19 = sshll.u32 %s201_s17, 1 }
  0x12   : > { %s207_s22 = scalar_lea.vmem %s729_s1, %s520_s18  ;;  %s669_s25 = scalar_lea.vmem %s730_s2, %s511_s19  ;;  %vm226_vm0 = vcmp.lt.s32.totalorder (%p218_p5), %v224_v0, 256 }
  0x13   : > { %228 = vst.msk [vmem:[#allocation2] sm:$0x3] (%p218_p5), %vm226_vm0, %v614_v1 }
  0x17 PF: > { %v332_v2 = vld [vmem:[%s728_s0] sm:$0xf]  ;;  %v615_v3 = vmov 0   ;;  %vm259_vm1 = vcmask 1043456   ;;  %p397_p6 = scmp.eq.s32.totalorder %s604_s12, 1  ;;  %v249_v24 = vlaneseq  ;;  %v616_v43 = vmov 0.0  }
  0x18   : > { %560 = vset.pattern.permute.xlu0 %v615_v3  ;;  %v229_v4 = vld [vmem:[%s207_s22] sm:$0xff]  ;;  %vm414_vm5 = vcmask (%p397_p6), 1040384  }
  0x19   : > { %335 = vperm.xlu0 %560, %v332_v2   ;;  %v245_v5 = vcombine.high %v229_v4, %v229_v4  ;;  %v260_v6 = vsel %vm259_vm1, %v229_v4, -inf  ;;  %v678_v25 = vshrl.u32 %v249_v24, 7  ;;  %v230_v29 = vld [vmem:[%s669_s25] sm:$0x3]  ;;  %vm394_vm4 = vcmp.lt.s32.totalorder %v249_v24, 256 }
  0x1a   : > { %v261_v8 = vrot.slane %v260_v6, 4 }
  0x1b   : > { %v267_v7 = vsel %vm259_vm1, %v245_v5, -inf  ;;  %v681_v28 = vsub.s32 0, %v678_v25  ;;  %v255_v30 = vsub.s32 1, %v678_v25 }
  0x1c   : > { %v268_v9 = vrot.slane %v267_v7, 4  ;;  %v262_v10 = vmax.f32 %v260_v6, %v261_v8 }
  0x1d   : > { %v252_v33 = vrot.slane %v230_v29, %v681_v28  ;;  %v256_v35 = vrot.slane %v230_v29, %v255_v30 }
  0x1e   : > { %v269_v11 = vmax.f32 %v267_v7, %v268_v9  ;;  %v263_v12 = vrot.slane %v262_v10, 2 }
  0x1f   : > { %v305_v38 = vrot.slane %v252_v33, %v681_v28  ;;  %v309_v40 = vrot.slane %v256_v35, %v681_v28  ;;  %v617_v35 = vmov 1966171168  }
  0x20   : > { %v270_v13 = vrot.slane %v269_v11, 2  ;;  %v264_v14 = vmax.f32 %v262_v10, %v263_v12 }
  0x21   : > { %vm310_vm2 = vcmp.eq.s32.totalorder %v678_v25, %v305_v38  ;;  %vm311_vm3 = vcmp.eq.s32.totalorder %v678_v25, %v309_v40 }
  0x22   : > { %v271_v15 = vmax.f32 %v269_v11, %v270_v13  ;;  %v265_v16 = vrot.slane %v264_v14, 1  ;;  %v513_v44 = vsel %vm310_vm2, 1.0, %v616_v43  ;;  %v514_v46 = vsel %vm311_vm3, 1.0, %v616_v43 }
  0x23   : > { %v316_v48 = vmul.f32 %v513_v44, %v229_v4  ;;  %v317_v49 = vmul.f32 %v514_v46, %v245_v5 }
  0x24   : > { %v272_v17 = vrot.slane %v271_v15, 1  ;;  %v266_v18 = vmax.f32 %v264_v14, %v265_v16 }
  0x25   : > { %v318_v52 = vsel %vm259_vm1, %v316_v48, 0.0  ;;  %v325_v53 = vsel %vm259_vm1, %v317_v49, 0.0 }
  0x26   : > { %v273_v19 = vmax.f32 %v271_v15, %v272_v17  ;;  %v274_v20 = vsub.f32 %v229_v4, %v266_v18  ;;  %v319_v56 = vrot.slane %v318_v52, 4  ;;  %v326_v57 = vrot.slane %v325_v53, 4 }
  0x28   : > { %v275_v21 = vsub.f32 %v245_v5, %v273_v19  ;;  %v276_v22 = vmul.f32 1.442695, %v274_v20  ;;  %v320_v58 = vadd.f32 %v319_v56, %v318_v52  ;;  %v327_v59 = vadd.f32 %v326_v57, %v325_v53  ;;  %v372_v53 = vld [vmem:[#allocation2] sm:$0x3] }
  0x2a   : > { %v278_v23 = vmul.f32 1.442695, %v275_v21  ;;  %562 = vpow2.f32 %v276_v22  ;;  %v321_v60 = vrot.slane %v320_v58, 2  ;;  %v328_v61 = vrot.slane %v327_v59, 2 }
  0x2c   : > { %564 = vpow2.f32 %v278_v23  ;;  %v322_v62 = vadd.f32 %v321_v60, %v320_v58  ;;  %v329_v0 = vadd.f32 %v328_v61, %v327_v59 }
  0x2e   : > { %v323_v3 = vrot.slane %v322_v62, 1  ;;  %v330_v5 = vrot.slane %v329_v0, 1 }
  0x30   : > { %v324_v7 = vadd.f32 %v323_v3, %v322_v62  ;;  %v331_v9 = vadd.f32 %v330_v5, %v329_v0 }
  0x34   : > { %v563_v26 = vpop.eup %562 }
  0x35   : > { %v280_v31 = vsel %vm259_vm1, %v563_v26, 0.0 }
  0x36   : > { %v565_v27 = vpop.eup %564  ;;  %v281_v34 = vrot.slane %v280_v31, 4 }
  0x37   : > { %v287_v32 = vsel %vm259_vm1, %v565_v27, 0.0 }
  0x38   : > { %v288_v36 = vrot.slane %v287_v32, 4  ;;  %v282_v37 = vadd.f32 %v281_v34, %v280_v31 }
  0x3a   : > { %v289_v39 = vadd.f32 %v288_v36, %v287_v32  ;;  %v283_v41 = vrot.slane %v282_v37, 2  ;;  %v377_v36 = vunpack.c.l.s4 %v617_v35 }
  0x3c   : > { %v290_v42 = vrot.slane %v289_v39, 2  ;;  %v284_v45 = vadd.f32 %v283_v41, %v282_v37  ;;  %v378_v43 = vunpack.c.0.s8 %v377_v36 }
  0x3e   : > { %v291_v47 = vadd.f32 %v290_v42, %v289_v39  ;;  %v285_v50 = vrot.slane %v284_v45, 1 }
  0x40   : > { %v292_v51 = vrot.slane %v291_v47, 1  ;;  %v286_v54 = vadd.f32 %v285_v50, %v284_v45  ;;  %v381_v50 = vsub.s32 %v378_v43, %v678_v25 }
  0x42   : > { %v293_v55 = vadd.f32 %v292_v51, %v291_v47  ;;  %566 = vlog2.f32 %v286_v54 }
  0x44   : > { %568 = vlog2.f32 %v293_v55 }
  0x4c   : > { %v567_v63 = vpop.eup %566 }
  0x4d   : > { %v295_v2 = vmul.f32 0.6931472, %v567_v63 }
  0x4e   : > { %v569_v1 = vpop.eup %568 }
  0x4f   : > { %v297_v4 = vmul.f32 0.6931472, %v569_v1  ;;  %v298_v6 = vadd.f32 %v295_v2, %v266_v18 }
  0x51   : > { %v299_v8 = vadd.f32 %v297_v4, %v273_v19  ;;  %v354_v10 = vsub.f32 %v298_v6, %v324_v7 }
  0x53   : > { %v355_v11 = vsub.f32 %v299_v8, %v331_v9  ;;  %v356_v12 = vsub.f32 0.0, %v354_v10 }
  0x55   : > { %v357_v13 = vsub.f32 0.0, %v355_v11  ;;  %v358_v14 = vmul.f32 1.442695, %v356_v12 }
  0x57   : > { %v360_v15 = vmul.f32 1.442695, %v357_v13  ;;  %570 = vpow2.f32 %v358_v14 }
  0x59   : > { %572 = vpow2.f32 %v360_v15 }
  0x61   : > { %v571_v23 = vpop.eup %570 }
  0x62   : > { %v362_v33 = vsub.f32 1.0, %v571_v23 }
  0x63   : > { %v573_v19 = vpop.eup %572 }
  0x64   : > { %v363_v34 = vsub.f32 1.0, %v573_v19  ;;  %v364_v41 = vmul.f32 %v362_v33, %v362_v33 }
  0x66   : > { %v365_v42 = vmul.f32 %v363_v34, %v363_v34 }
  0x98   : > { %v336_v16 = vpop.permute.xlu0 %335 }
  0x99   : > { %v338_v17 = vmul.f32 %v513_v44, %v336_v16  ;;  %v339_v20 = vmul.f32 %v514_v46, %v336_v16 }
  0x9b   : > { %v340_v21 = vsel %vm259_vm1, %v338_v17, 0.0  ;;  %v347_v22 = vsel %vm259_vm1, %v339_v20, 0.0 }
  0x9c   : > { %v341_v18 = vrot.slane %v340_v21, 4  ;;  %v348_v26 = vrot.slane %v347_v22, 4 }
  0x9e   : > { %v342_v27 = vadd.f32 %v341_v18, %v340_v21  ;;  %v349_v29 = vadd.f32 %v348_v26, %v347_v22 }
  0xa0   : > { %v343_v31 = vrot.slane %v342_v27, 2  ;;  %v350_v32 = vrot.slane %v349_v29, 2 }
  0xa2   : > { %v344_v37 = vadd.f32 %v343_v31, %v342_v27  ;;  %v351_v38 = vadd.f32 %v350_v32, %v349_v29 }
  0xa4   : > { %v345_v39 = vrot.slane %v344_v37, 1  ;;  %v352_v40 = vrot.slane %v351_v38, 1 }
  0xa6   : > { %v346_v44 = vadd.f32 %v345_v39, %v344_v37  ;;  %v353_v45 = vadd.f32 %v352_v40, %v351_v38 }
  0xa8   : > { %v366_v46 = vmul.f32 %v364_v41, %v346_v44  ;;  %v367_v47 = vmul.f32 %v365_v42, %v353_v45 }
  0xaa   : > { %v368_v48 = vmul.f32 %v366_v46, %v354_v10  ;;  %v369_v49 = vmul.f32 %v367_v47, %v355_v11 }
  0xac   : > { %v375_v51 = vcombine.low %v368_v48, %v369_v49 }
  0xae   : > { %v382_v52 = vrot.slane %v375_v51, %v381_v50  ;;  %401 = sbr.rel (!%p397_p6) target bundleno = 400 (0x190), region = 40 }
  0xb0   : > { %v389_v54 = vrot.slane %v382_v52, %v381_v50 }
  0xb2   : > { %v391_v55 = vadd.f32 %v389_v54, %v372_v53 }
  0xb4   : > { %396 = vst.msk [vmem:[#allocation2] sm:$0x3] %vm394_vm4, %v391_v55 }
  0xbb   : > { %v402_v56 = vld [vmem:[#allocation2] sm:$0x3] }
  0xbc   : > { %v407_v57 = vrot.slane %v402_v56, %v681_v28  ;;  %v411_v58 = vrot.slane %v402_v56, %v255_v30 }
  0xbe   : > { %v415_v59 = vsel %vm414_vm5, %v407_v57, 0.0  ;;  %v416_v60 = vsel %vm414_vm5, %v411_v58, 0.0 }
  0xbf   : > { %v417_v61 = vadd.f32 %v416_v60, %v415_v59 }
  0xc1   : > { %418 = vadd.xlane.f32.xlu0 %v417_v61 }
 0x14e   : > { %v419_v62 = vpop.xlane.xlu0 %418 }
 0x14f   : > { %v420_v63 = vrot.slane %v419_v62, 4 }
 0x151   : > { %v421_v0 = vadd.f32 %v420_v63, %v419_v62 }
 0x153   : > { %v422_v24 = vrot.slane %v421_v0, 2 }
 0x155   : > { %v423_v1 = vadd.f32 %v422_v24, %v421_v0 }
 0x157   : > { %v424_v2 = vrot.slane %v423_v1, 1 }
 0x159   : > { %v425_v3 = vadd.f32 %v424_v2, %v423_v1 }
 0x15b   : > { %523 = vpush %v425_v3 }
 0x18c   : > { %s524_s28 = spop %523 }
 0x18d   : > { %s427_s29 = smul.f32 0.001953125, %s524_s28 }
 0x18f   : > { %429 = sst [smem:[#allocation3]] %s427_s29 }
 0x190 PF: > { %p529_p7 = scmp.eq.s32.totalorder %s505_s15, 1  ;;  %s574_s5 = scalar_lea.hbm %s731_s3, 16 }
 0x191   : > { %p575_p8 = scmp.ne.s32.totalorder %s731_s3, %s574_s5  ;;  %p580_p11 = scmp.lt.u32.totalorder %s574_s5, %s731_s3 }
 0x193   : > { %p576_p9 = pnand %p575_p8, %p529_p7 }
 0x195   : > { %p577_p10 = pneg %p576_p9 }
 0x197   : > { %p582_p12 = pnand %p580_p11, %p577_p10 }
 0x199   : > { %585 = shalt.err (!%p582_p12)
}
 0x19a   : > { %s618_s10 = smov [#allocation3]  }
 0x19b   : > { %526 = dma.smem_to_hbm (%p529_p7), %s618_s10, 16, %s731_s3, [#allocation4]  }
 0x19c   : > { %599 = dma.done.wait (%p529_p7), [#allocation4], 16  }
 0x19d   : > { %601 = vsyncadd (%p529_p7), [#allocation4], 4294967280 }
 0x19e   : > { %443 = sfence }
 0x19f PF: > { %s14_s14 = sadd.s32 1, %s612_s14   ;;  %s732_s12 = smov %s608_s13 }
 0x1a0   : > { %p11_p13 = scmp.ge.s32.totalorder %s14_s14, 4   ;;  %s733_s13 = smov %s735_s16 }
 0x1a2   :  { %13 = sbr.rel (!%p11_p13) target bundleno = 2 (0x2), region = 71 }
 0x1a9   :  { %449 = vsyncpa [#allocation4], 1 }
 0x1aa   :  { %451 = vsyncpa [#allocation4 + $0x1], 1 }

</bundles_post_ra>
